<compile_context>
chip_gen: v7x
topology: tpu7x:2x2x1
jax: 0.10.0
libtpu: 0.0.40
codegen_flags: <defaults>
</compile_context>

<pallas_src>
import functools

import jax
import jax.numpy as jnp
from jax.experimental import pallas as pl
from jax.experimental.pallas import tpu as pltpu

LN_EPS = 1e-5


def _round_up(v, m):
    return (v + m - 1) // m * m


def _ln_linear_kernel(x_ref, gamma_ref, beta_ref, w_ref, b_ref, o_ref, *, true_h):
    """Fused LayerNorm + Linear for one row tile.

    x_ref:     [TM, Hp]  input rows (hidden zero-padded to Hp)
    gamma_ref: [1, Hp]   LN scale   (zero in padded lanes)
    beta_ref:  [1, Hp]   LN shift   (zero in padded lanes)
    w_ref:     [Op, Hp]  Linear weight in PyTorch [out, in] layout (bf16)
    b_ref:     [1, Op]   Linear bias (zero in padded lanes)
    o_ref:     [TM, Op]  output rows
    """
    x = x_ref[...].astype(jnp.float32)

    # Single-pass fused mean/variance: E[x^2] - E[x]^2.  Padded lanes are
    # zero, so the sums are unaffected; divide by the true hidden size.
    inv_h = 1.0 / float(true_h)
    s1 = jnp.sum(x, axis=-1, keepdims=True)
    s2 = jnp.sum(x * x, axis=-1, keepdims=True)
    mean = s1 * inv_h
    var = jnp.maximum(s2 * inv_h - mean * mean, 0.0)
    inv = jax.lax.rsqrt(var + LN_EPS)

    xn = (x - mean) * inv
    xn = xn * gamma_ref[...].astype(jnp.float32) + beta_ref[...].astype(jnp.float32)

    # bf16 MXU matmul with f32 accumulation; contract xn's hidden axis with
    # the weight's hidden axis directly (no transpose needed).
    y = jax.lax.dot_general(
        xn.astype(w_ref.dtype), w_ref[...],
        dimension_numbers=(((1,), (1,)), ((), ())),
        preferred_element_type=jnp.float32)
    y = y + b_ref[...].astype(jnp.float32)

    # Dropout(p=0) is the identity -> nothing to do.
    o_ref[...] = y.astype(o_ref.dtype)


def pre_post_processing_wrapper(x, gamma, beta, weight, bias, *,
                                row_tile=256, matmul_dtype=jnp.bfloat16):
    """x: [B, S, H]; weight: [O, H] (PyTorch Linear layout); bias: [O]."""
    B, S, H = x.shape
    O = weight.shape[0]
    R = B * S

    # Lane-dense padding (multiples of 128) and row-tile sizing.
    Hp = _round_up(H, 128)
    Op = _round_up(O, 128)
    TM = min(row_tile, _round_up(R, 8))
    Rp = _round_up(R, TM)

    x2d = jnp.pad(x.reshape(R, H), ((0, Rp - R), (0, Hp - H)))
    gamma_p = jnp.pad(gamma, (0, Hp - H)).reshape(1, Hp)
    beta_p = jnp.pad(beta, (0, Hp - H)).reshape(1, Hp)
    # TODO(synk): in production, pre-cast/pad the bf16 weight once outside the
    # per-call path (cache it) instead of re-deriving it every forward.
    w_p = jnp.pad(weight, ((0, Op - O), (0, Hp - H))).astype(matmul_dtype)
    b_p = jnp.pad(bias, (0, Op - O)).reshape(1, Op)

    # VMEM budget: double-buffered x/out blocks + resident weight + params.
    x_blk = TM * Hp * x2d.dtype.itemsize
    w_blk = Op * Hp * jnp.dtype(matmul_dtype).itemsize
    o_blk = TM * Op * x.dtype.itemsize
    p_blk = (2 * Hp + Op) * 4
    vmem_limit = int(min(100 * 2**20,
                         max(32 * 2**20,
                             2.5 * (x_blk + w_blk + o_blk + p_blk))))

    cost = pl.CostEstimate(
        flops=2 * R * H * O,
        transcendentals=R,
        bytes_accessed=int(x2d.size * x2d.dtype.itemsize
                           + w_p.size * w_p.dtype.itemsize
                           + Rp * Op * x.dtype.itemsize
                           + p_blk),
    )

    kernel = functools.partial(_ln_linear_kernel, true_h=H)

    out2d = pl.pallas_call(
        kernel,
        out_shape=jax.ShapeDtypeStruct((Rp, Op), x.dtype),
        grid_spec=pltpu.PrefetchScalarGridSpec(
            num_scalar_prefetch=0,
            grid=(Rp // TM,),
            in_specs=[
                pl.BlockSpec((TM, Hp), lambda i: (i, 0)),   # x rows (pipelined)
                pl.BlockSpec((1, Hp), lambda i: (0, 0)),    # gamma (resident)
                pl.BlockSpec((1, Hp), lambda i: (0, 0)),    # beta  (resident)
                pl.BlockSpec((Op, Hp), lambda i: (0, 0)),   # weight (resident)
                pl.BlockSpec((1, Op), lambda i: (0, 0)),    # bias  (resident)
            ],
            out_specs=pl.BlockSpec((TM, Op), lambda i: (i, 0)),
        ),
        compiler_params=pltpu.CompilerParams(
            dimension_semantics=("parallel",),
            vmem_limit_bytes=vmem_limit),
        cost_estimate=cost,
    )(x2d, gamma_p, beta_p, w_p, b_p)

    return out2d[:R, :O].reshape(B, S, O)


def _reference(x, gamma, beta, weight, bias):
    xf = x.astype(jnp.float32)
    mean = jnp.mean(xf, axis=-1, keepdims=True)
    var = jnp.mean((xf - mean) ** 2, axis=-1, keepdims=True)
    xn = (xf - mean) * jax.lax.rsqrt(var + LN_EPS)
    xn = xn * gamma + beta
    return xn @ weight.T.astype(jnp.float32) + bias


if __name__ == "__main__":
    key = jax.random.PRNGKey(0)
    B, S, H = 2, 8, 32

    k_x, k_w, k_b = jax.random.split(key, 3)
    x = jax.random.normal(k_x, (B, S, H), dtype=jnp.float32)

    # nn.LayerNorm(H) default init: gamma=ones, beta=zeros.
    gamma = jnp.ones((H,), dtype=jnp.float32)
    beta = jnp.zeros((H,), dtype=jnp.float32)
    # Wrapped layer = Linear(H, H), PyTorch default uniform init bounds.
    bound = 1.0 / (H ** 0.5)
    weight = jax.random.uniform(k_w, (H, H), minval=-bound, maxval=bound,
                                dtype=jnp.float32)
    bias = jax.random.uniform(k_b, (H,), minval=-bound, maxval=bound,
                              dtype=jnp.float32)

    y = jax.block_until_ready(
        pre_post_processing_wrapper(x, gamma, beta, weight, bias))

    y_ref = _reference(x, gamma, beta, weight, bias)
    assert y.shape == (B, S, H)
    # bf16 matmul operands (f32 accumulation) -> relaxed tolerance.
    assert jnp.allclose(y, y_ref, atol=3e-2, rtol=3e-2), "mismatch vs reference"

    print("KERNEL_OK")
</pallas_src>

<mosaic_0001>
module attributes {stable_mosaic.version = 11 : i64} {
  func.func @_ln_linear_kernel(%arg0: i32, %arg1: memref<16x128xf32, #tpu.memory_space<vmem>>, %arg2: memref<1x128xf32, #tpu.memory_space<vmem>>, %arg3: memref<1x128xf32, #tpu.memory_space<vmem>>, %arg4: memref<128x128xbf16, #tpu.memory_space<vmem>>, %arg5: memref<1x128xf32, #tpu.memory_space<vmem>>, %arg6: memref<16x128xf32, #tpu.memory_space<vmem>>) attributes {dimension_semantics = [#tpu.dimension_semantics<parallel>], iteration_bounds = array<i64: 1>, scalar_prefetch = 0 : i64, scratch_operands = 0 : i64, tpu.core_type = #tpu.core_type<tc>, window_params = [{transform_indices = @transform_0, window_bounds = array<i64: 16, 128>}, {pipeline_mode = #tpu.pipeline_mode<synchronous>, transform_indices = @transform_1, window_bounds = array<i64: 1, 128>}, {pipeline_mode = #tpu.pipeline_mode<synchronous>, transform_indices = @transform_2, window_bounds = array<i64: 1, 128>}, {pipeline_mode = #tpu.pipeline_mode<synchronous>, transform_indices = @transform_3, window_bounds = array<i64: 128, 128>}, {pipeline_mode = #tpu.pipeline_mode<synchronous>, transform_indices = @transform_4, window_bounds = array<i64: 1, 128>}, {transform_indices = @transform_5, window_bounds = array<i64: 16, 128>}]} {
    %c0 = arith.constant 0 : index
    %c0_0 = arith.constant 0 : index
    %0 = vector.load %arg1[%c0, %c0_0] : memref<16x128xf32, #tpu.memory_space<vmem>>, vector<16x128xf32>
    %cst = arith.constant dense<0.000000e+00> : vector<16xf32>
    %1 = vector.multi_reduction <add>, %0, %cst [1] : vector<16x128xf32> to vector<16xf32>
    %2 = vector.shape_cast %1 : vector<16xf32> to vector<16x1xf32>
    %3 = arith.mulf %0, %0 : vector<16x128xf32>
    %cst_1 = arith.constant dense<0.000000e+00> : vector<16xf32>
    %4 = vector.multi_reduction <add>, %3, %cst_1 [1] : vector<16x128xf32> to vector<16xf32>
    %5 = vector.shape_cast %4 : vector<16xf32> to vector<16x1xf32>
    %cst_2 = arith.constant 3.125000e-02 : f32
    %6 = vector.broadcast %cst_2 : f32 to vector<16x1xf32>
    %7 = arith.mulf %2, %6 : vector<16x1xf32>
    %cst_3 = arith.constant 3.125000e-02 : f32
    %8 = vector.broadcast %cst_3 : f32 to vector<16x1xf32>
    %9 = arith.mulf %5, %8 : vector<16x1xf32>
    %10 = arith.mulf %7, %7 : vector<16x1xf32>
    %11 = arith.subf %9, %10 : vector<16x1xf32>
    %cst_4 = arith.constant 0.000000e+00 : f32
    %12 = vector.broadcast %cst_4 : f32 to vector<16x1xf32>
    %13 = arith.maximumf %11, %12 : vector<16x1xf32>
    %cst_5 = arith.constant 9.99999974E-6 : f32
    %14 = vector.broadcast %cst_5 : f32 to vector<16x1xf32>
    %15 = arith.addf %13, %14 : vector<16x1xf32>
    %16 = math.rsqrt %15 : vector<16x1xf32>
    %17 = vector.broadcast %7 : vector<16x1xf32> to vector<16x128xf32>
    %18 = arith.subf %0, %17 : vector<16x128xf32>
    %19 = vector.broadcast %16 : vector<16x1xf32> to vector<16x128xf32>
    %20 = arith.mulf %18, %19 : vector<16x128xf32>
    %c0_6 = arith.constant 0 : index
    %c0_7 = arith.constant 0 : index
    %21 = vector.load %arg2[%c0_6, %c0_7] : memref<1x128xf32, #tpu.memory_space<vmem>>, vector<1x128xf32>
    %22 = vector.broadcast %21 : vector<1x128xf32> to vector<16x128xf32>
    %23 = arith.mulf %20, %22 : vector<16x128xf32>
    %c0_8 = arith.constant 0 : index
    %c0_9 = arith.constant 0 : index
    %24 = vector.load %arg3[%c0_8, %c0_9] : memref<1x128xf32, #tpu.memory_space<vmem>>, vector<1x128xf32>
    %25 = vector.broadcast %24 : vector<1x128xf32> to vector<16x128xf32>
    %26 = arith.addf %23, %25 : vector<16x128xf32>
    %27 = arith.truncf %26 : vector<16x128xf32> to vector<16x128xbf16>
    %c0_10 = arith.constant 0 : index
    %c0_11 = arith.constant 0 : index
    %28 = vector.load %arg4[%c0_10, %c0_11] : memref<128x128xbf16, #tpu.memory_space<vmem>>, vector<128x128xbf16>
    %cst_12 = arith.constant dense<0.000000e+00> : vector<16x128xf32>
    %29 = tpu.matmul %27, %28, %cst_12 {dimension_numbers = #tpu.dot_dimension_numbers<[1], [1], [0], [0], [0, 0, 1, 0], [], []>} : vector<16x128xbf16>, vector<128x128xbf16>, vector<16x128xf32> -> vector<16x128xf32>
    %c0_13 = arith.constant 0 : index
    %c0_14 = arith.constant 0 : index
    %30 = vector.load %arg5[%c0_13, %c0_14] : memref<1x128xf32, #tpu.memory_space<vmem>>, vector<1x128xf32>
    %31 = vector.broadcast %30 : vector<1x128xf32> to vector<16x128xf32>
    %32 = arith.addf %29, %31 : vector<16x128xf32>
    %c0_15 = arith.constant 0 : index
    %c0_16 = arith.constant 0 : index
    %33 = vector.load %arg6[%c0_15, %c0_16] : memref<16x128xf32, #tpu.memory_space<vmem>>, vector<16x128xf32>
    tpu.vector_store %arg6[%c0_15, %c0_16], %32 {strides = array<i32>} : memref<16x128xf32, #tpu.memory_space<vmem>>, vector<16x128xf32>,
    return
  }
  func.func @transform_0(%arg0: i32) -> (i32, i32) {
    %c0_i32 = arith.constant 0 : i32
    %c0_i32_0 = arith.constant 0 : i32
    return %arg0, %c0_i32 : i32, i32
  }
  func.func @transform_1(%arg0: i32) -> (i32, i32) {
    %c0_i32 = arith.constant 0 : i32
    %c0_i32_0 = arith.constant 0 : i32
    %c0_i32_1 = arith.constant 0 : i32
    return %c0_i32, %c0_i32_0 : i32, i32
  }
  func.func @transform_2(%arg0: i32) -> (i32, i32) {
    %c0_i32 = arith.constant 0 : i32
    %c0_i32_0 = arith.constant 0 : i32
    %c0_i32_1 = arith.constant 0 : i32
    return %c0_i32, %c0_i32_0 : i32, i32
  }
  func.func @transform_3(%arg0: i32) -> (i32, i32) {
    %c0_i32 = arith.constant 0 : i32
    %c0_i32_0 = arith.constant 0 : i32
    %c0_i32_1 = arith.constant 0 : i32
    return %c0_i32, %c0_i32_0 : i32, i32
  }
  func.func @transform_4(%arg0: i32) -> (i32, i32) {
    %c0_i32 = arith.constant 0 : i32
    %c0_i32_0 = arith.constant 0 : i32
    %c0_i32_1 = arith.constant 0 : i32
    return %c0_i32, %c0_i32_0 : i32, i32
  }
  func.func @transform_5(%arg0: i32) -> (i32, i32) {
    %c0_i32 = arith.constant 0 : i32
    %c0_i32_0 = arith.constant 0 : i32
    return %arg0, %c0_i32 : i32, i32
  }
}

</mosaic_0001>

<bundles_post_ra>
// kernel: tpu_custom_call.1
= control target key start
LH: loop header
LB: loop body
LE: loop exit
PB: predicated region body
PF: predicated region fallthrough
CT: control target
= control target key end

     0   :  { %10 = vsyncpa [#allocation3], 0  ;;  %s454_s0 = inlined_call_operand.hbm [shape: f32[16,128], index: 0, kind: input, shape index: {}]   ;;  %s455_s1 = inlined_call_operand.vmem [shape: f32[1,128], index: 1, kind: input, shape index: {}]   ;;  %s456_s2 = inlined_call_operand.vmem [shape: f32[1,128], index: 2, kind: input, shape index: {}]   ;;  %s457_s3 = inlined_call_operand.hbm [shape: bf16[128,128], index: 3, kind: input, shape index: {}]   ;;  %s458_s4 = inlined_call_operand.vmem [shape: f32[1,128], index: 4, kind: input, shape index: {}]   ;;  %s459_s5 = inlined_call_operand.hbm [shape: f32[16,128], index: 5, kind: output, shape index: {}]  }
   0x1   :  { %11 = vsyncpa [#allocation6], 0 }
   0x2   :  { %12 = vsyncpa [#allocation4], 0  ;;  %s364_s18 = smov [#allocation2]   ;;  %s292_s22 = scalar_lea.hbm %s454_s0, 256 }
   0x3   :  { %s18_s19 = sshll.u32 %s364_s18, 4  ;;  %p293_p0 = scmp.ne.s32.totalorder %s454_s0, %s292_s22  ;;  %s19_s19 = int_to_ptr.vmem [resolvable:$true] %s18_s19 }
   0x4   :  { %p296_p1 = scmp.lt.u32.totalorder %s292_s22, %s454_s0 }
   0x6   :  { %p298_p2 = pnand %p296_p1, %p293_p0 }
   0x8   :  { %301 = shalt.err (!%p298_p2)
}
   0x9   :  { %s302_s27 = scalar_lea.vmem %s19_s19, 256  ;;  %p307_p4 = scmp.lt.s32.totalorder %s19_s19, %s19_s19 }
   0xa   :  { %p303_p3 = scmp.ne.s32.totalorder %s19_s19, %s302_s27  ;;  %p308_p5 = scmp.lt.s32.totalorder %s302_s27, %s302_s27 }
   0xc   :  { %p309_p6 = por %p308_p5, %p307_p4 }
   0xe   :  { %p310_p7 = pnand %p309_p6, %p303_p3 }
  0x10   :  { %313 = shalt.err (!%p310_p7)
}
  0x11   :  { %s365_s28 = smov 128   ;;  %s366_s29 = smov 8  }
  0x12   :  { %24 = dma.hbm_to_vmem [thread:$0]  %s454_s0, 256, %s19_s19, [#allocation3], %s365_s28, %s365_s28, %s366_s29  }
  0x13   :  { %s367_s7 = smov [#allocation5]   ;;  %s314_s11 = scalar_lea.hbm %s457_s3, 1024 }
  0x14   :  { %s34_s8 = sshll.u32 %s367_s7, 4  ;;  %p315_p8 = scmp.ne.s32.totalorder %s457_s3, %s314_s11  ;;  %s35_s8 = int_to_ptr.vmem [resolvable:$true] %s34_s8 }
  0x15   :  { %p318_p9 = scmp.lt.u32.totalorder %s314_s11, %s457_s3 }
  0x17   :  { %p320_p10 = pnand %p318_p9, %p315_p8 }
  0x19   :  { %323 = shalt.err (!%p320_p10)
}
  0x1a   :  { %s324_s16 = scalar_lea.vmem %s35_s8, 1024  ;;  %p329_p12 = scmp.lt.s32.totalorder %s35_s8, %s35_s8 }
  0x1b   :  { %p325_p11 = scmp.ne.s32.totalorder %s35_s8, %s324_s16  ;;  %p330_p13 = scmp.lt.s32.totalorder %s324_s16, %s324_s16 }
  0x1d   :  { %p331_p0 = por %p330_p13, %p329_p12 }
  0x1f   :  { %p332_p1 = pnand %p331_p0, %p325_p11 }
  0x21   :  { %335 = shalt.err (!%p332_p1)
}
  0x22   :  { %s368_s0 = smov 64   ;;  %s369_s17 = smov 4  }
  0x23   :  { %40 = dma.hbm_to_vmem [thread:$0]  %s457_s3, 1024, %s35_s8, [#allocation6], %s368_s0, %s368_s0, %s369_s17  }
  0x24   :  { %358 = dma.done.wait [#allocation3], 256  }
  0x25   :  { %359 = vsyncadd [#allocation3], 4294967040 }
  0x26   :  { %360 = dma.done.wait [#allocation6], 1024  }
  0x27   :  { %361 = vsyncadd [#allocation6], 4294966272  ;;  %v370_v0 = vmov 0.0   ;;  %v50_v1 = vld [vmem:[#allocation2] sm:$0xff]  ;;  %v51_v2 = vld [vmem:[#allocation2 + $0x8] sm:$0xff]  ;;  %vm371_vm0 = vmmov 0  }
  0x28   :  { %251 = vmatprep.subr.bf16.mxu0 %v370_v0  ;;  %52 = vadd.xlane.f32.xlu0 %v50_v1  ;;  %v56_v3 = vmul.f32 %v50_v1, %v50_v1  ;;  %v280_v4 = vld [vmem:[#allocation5] sm:$0xff]   ;;  %v57_v5 = vmul.f32 %v51_v2, %v51_v2  ;;  %v281_v6 = vld [vmem:[#allocation5 + $0x8] sm:$0xff]   ;;  %v282_v7 = vld [vmem:[#allocation5 + $0x10] sm:$0xff]   ;;  %s372_s25 = smov [#allocation7]  }
  0x29   :  { %252 = vmatpush3.bf16.xpose.msra.mxu0 %v280_v4  ;;  %v283_v8 = vld [vmem:[#allocation5 + $0x18] sm:$0xff]   ;;  %267 = vmatprep.mubr.msk.bf16.mxu0 %vm371_vm0, %v370_v0  ;;  %v284_v9 = vld [vmem:[#allocation5 + $0x20] sm:$0xff]   ;;  %v285_v10 = vld [vmem:[#allocation5 + $0x28] sm:$0xff]  }
  0x2a   :  { %58 = vadd.xlane.f32.xlu1 %v56_v3  ;;  %253 = vmatprep.subr.bf16.mxu0 %v370_v0  ;;  %v286_v11 = vld [vmem:[#allocation5 + $0x30] sm:$0xff]   ;;  %v287_v12 = vld [vmem:[#allocation5 + $0x38] sm:$0xff]  }
  0x2b   :  { %v231_v32 = vld [vmem:[%s455_s1] ss:$0 sm:$0xff]  ;;  %s218_s1 = sshll.u32 %s372_s25, 4  ;;  %s219_s1 = int_to_ptr.vmem [resolvable:$true] %s218_s1 }
  0x2c   :  { %54 = vadd.xlane.f32.xlu0 %v51_v2  ;;  %v232_v37 = vld [vmem:[%s456_s2] ss:$0 sm:$0xff]  ;;  %s336_s2 = scalar_lea.vmem %s219_s1, 256  ;;  %p341_p3 = scmp.lt.s32.totalorder %s219_s1, %s219_s1 }
  0x2d   :  { %v233_v42 = vld [vmem:[%s458_s4] ss:$0 sm:$0xff]  ;;  %p337_p2 = scmp.ne.s32.totalorder %s219_s1, %s336_s2  ;;  %p342_p4 = scmp.lt.s32.totalorder %s336_s2, %s336_s2 }
  0x2e   :  { %60 = vadd.xlane.f32.xlu1 %v57_v5 }
  0x2f   :  { %p343_p5 = por %p342_p4, %p341_p3 }
  0x31   :  { %254 = vmatpush3.bf16.xpose.msra.mxu0 %v281_v6  ;;  %p344_p6 = pnand %p343_p5, %p337_p2 }
  0x32   :  { %255 = vmatprep.subr.bf16.mxu0 %v370_v0 }
  0x39   :  { %256 = vmatpush3.bf16.xpose.msra.mxu0 %v282_v7 }
  0x3a   :  { %257 = vmatprep.subr.bf16.mxu0 %v370_v0 }
  0x41   :  { %258 = vmatpush3.bf16.xpose.msra.mxu0 %v283_v8 }
  0x42   :  { %259 = vmatprep.subr.bf16.mxu0 %v370_v0 }
  0x49   :  { %260 = vmatpush3.bf16.xpose.msra.mxu0 %v284_v9 }
  0x4a   :  { %261 = vmatprep.subr.bf16.mxu0 %v370_v0 }
  0x51   :  { %262 = vmatpush3.bf16.xpose.msra.mxu0 %v285_v10 }
  0x52   :  { %263 = vmatprep.subr.bf16.mxu0 %v370_v0 }
  0x59   :  { %264 = vmatpush3.bf16.xpose.msra.mxu0 %v286_v11 }
  0x5a   :  { %265 = vmatprep.subr.bf16.mxu0 %v370_v0 }
  0x61   :  { %266 = vmatpush3.bf16.xpose.msra.mxu0 %v287_v12 }
  0xb5   :  { %v53_v13 = vpop.xlane.xlu0 %52 }
  0xb6   :  { %v62_v14 = vmul.f32 0.03125, %v53_v13 }
  0xb7   :  { %v59_v15 = vpop.xlane.xlu1 %58 }
  0xb8   :  { %v66_v16 = vmul.f32 %v62_v14, %v62_v14  ;;  %v64_v17 = vmul.f32 0.03125, %v59_v15  ;;  %v76_v29 = vsub.f32 %v50_v1, %v62_v14 }
  0xb9   :  { %v55_v18 = vpop.xlane.xlu0 %54 }
  0xba   :  { %v68_v19 = vsub.f32 %v64_v17, %v66_v16  ;;  %v63_v20 = vmul.f32 0.03125, %v55_v18 }
  0xbb   :  { %v61_v21 = vpop.xlane.xlu1 %60 }
  0xbc   :  { %v70_v22 = vmax.f32 %v68_v19, 0.0  ;;  %v67_v23 = vmul.f32 %v63_v20, %v63_v20  ;;  %v65_v24 = vmul.f32 0.03125, %v61_v21  ;;  %v77_v33 = vsub.f32 %v51_v2, %v63_v20 }
  0xbe   :  { %v72_v25 = vadd.f32 1e-05, %v70_v22  ;;  %v69_v26 = vsub.f32 %v65_v24, %v67_v23 }
  0xc0   :  { %288 = vrsqrt.f32 %v72_v25  ;;  %v71_v27 = vmax.f32 %v69_v26, 0.0 }
  0xc2   :  { %v73_v28 = vadd.f32 1e-05, %v71_v27 }
  0xc4   :  { %290 = vrsqrt.f32 %v73_v28 }
  0xca   :  { %v289_v30 = vpop.eup %288 }
  0xcb   :  { %v78_v31 = vmul.f32 %v289_v30, %v76_v29 }
  0xcd   :  { %v87_v36 = vmul.f32 %v231_v32, %v78_v31 }
  0xce   :  { %v291_v34 = vpop.eup %290 }
  0xcf   :  { %v79_v35 = vmul.f32 %v291_v34, %v77_v33  ;;  %v96_v39 = vadd.f32 %v232_v37, %v87_v36 }
  0xd1   :  { %v88_v38 = vmul.f32 %v231_v32, %v79_v35 }
  0xd3   :  { %v97_v40 = vadd.f32 %v232_v37, %v88_v38 }
  0xd5   :  { %v98_v41 = vpack.c.bf16 %v97_v40, %v96_v39 }
  0xd7   :  { %268 = vmatmul.mubr.bf16.vlgmr.msra.gmra.mrb[0].mxu0 %v98_v41 }
 0x1aa   :  { %v204_v43 = vpop.f32.mrb[0].mxu0 }
 0x1ab   :  { %v205_v44 = vadd.f32 %v233_v42, %v204_v43  ;;  %v269_v45 = vpop.f32.mrb[1].mxu0 }
 0x1ac   :  { %v207_v46 = vpop.f32.mrb[2].mxu0 }
 0x1ad   :  { %211 = vst [vmem:[#allocation7] sm:$0xff] %v205_v44  ;;  %v208_v47 = vadd.f32 %v233_v42, %v207_v46  ;;  %v270_v48 = vpop.f32.mrb[3].mxu0 }
 0x1af   :  { %212 = vst [vmem:[#allocation7 + $0x8] sm:$0xff] %v208_v47 }
 0x1b0   :  { %347 = shalt.err (!%p344_p6)
}
 0x1b1   :  { %s348_s27 = scalar_lea.hbm %s459_s5, 256 }
 0x1b2   :  { %p349_p7 = scmp.ne.s32.totalorder %s459_s5, %s348_s27  ;;  %p352_p8 = scmp.lt.u32.totalorder %s348_s27, %s459_s5 }
 0x1b4   :  { %p354_p9 = pnand %p352_p8, %p349_p7 }
 0x1b6   :  { %357 = shalt.err (!%p354_p9)
}
 0x1b7   :  { %224 = dma.vmem_to_hbm [thread:$0]  %s219_s1, 256, %s459_s5, [#allocation4], %s365_s28, %s365_s28, %s366_s29  }
 0x1b8   :  { %362 = dma.done.wait [#allocation4], 256  }
 0x1b9   :  { %363 = vsyncadd [#allocation4], 4294967040 }
 0x1ba   :  { %228 = vsyncpa [#allocation3], 1 }
 0x1bb   :  { %229 = vsyncpa [#allocation6], 1 }
 0x1bc   :  { %230 = vsyncpa [#allocation4], 1 }

</bundles_post_ra>
